<compile_context>
chip_gen: v7x
topology: tpu7x:2x2x1
jax: 0.10.0
libtpu: 0.0.40
codegen_flags: <defaults>
</compile_context>

<pallas_src>
import functools

import jax
import jax.numpy as jnp
from jax.experimental import pallas as pl
from jax.experimental.pallas import tpu as pltpu


# ----------------------------- Pallas kernel --------------------------------
def _nca_rollout_kernel(s_ref, m_ref, wc_ref, b1_ref, w2_ref, o_ref, *,
                        width, num_steps):
    # s_ref : [1, C, HW]      initial cell state for this batch element
    # m_ref : [1, T, 1, HW]   per-step stochastic update mask * dt
    # wc_ref: [F, 9*C]        fc1 weight with the 3x3 stencil folded in
    # b1_ref: [F, 1]          fc1 bias (f32)
    # w2_ref: [C, F]          fc2 weight (delta = w2 @ hidden)
    # o_ref : [1, C, HW]      state after num_steps Euler steps
    s0 = s_ref[0]                                  # [C, HW] f32
    c, hw = s0.shape
    w = width
    mm_dtype = wc_ref.dtype
    wc = wc_ref[...]                               # [F, 9C]
    b1 = b1_ref[...]                               # [F, 1]
    w2 = w2_ref[...]                               # [C, F]

    def lroll(a, shift):
        # out[p] = a[(p - shift) mod HW]   (np.roll semantics, lane rotation)
        return pltpu.roll(a, shift % hw, axis=1)

    # Column-position masks for the within-row (W-direction) circular wrap of
    # the flattened H*W lane axis.  Hoisted out of the step loop.
    col = jax.lax.broadcasted_iota(jnp.int32, s0.shape, 1) % w
    first_col = col == 0
    last_col = col == (w - 1)

    def step(t, s):
        # W-direction circular shifts (roll + boundary-column select fix-up).
        left = jnp.where(first_col, lroll(s, -(w - 1)), lroll(s, 1))   # x-1
        right = jnp.where(last_col, lroll(s, w - 1), lroll(s, -1))     # x+1
        cols = (left, s, right)                                        # dj=-1,0,1

        # hidden = relu(Wc @ z + b1), computed as 3 accumulating K=3*C MXU
        # matmuls (one per stencil row di) so only 3 taps are live at once.
        acc = None
        for gi, di in enumerate((-1, 0, 1)):
            if di == 0:
                group = cols
            else:
                # H-direction circular shift is an exact flat roll by di*W.
                group = tuple(lroll(a, -di * w) for a in cols)
            zg = jnp.concatenate(group, axis=0).astype(mm_dtype)       # [3C, HW]
            part = jnp.dot(wc[:, gi * 3 * c:(gi + 1) * 3 * c], zg,
                           preferred_element_type=jnp.float32)
            acc = part if acc is None else acc + part
        hidden = jnp.maximum(acc + b1, 0.0)                            # [F, HW] f32

        # delta_s = w2 @ hidden ; Euler update with this step's mask * dt.
        delta = jnp.dot(w2, hidden.astype(mm_dtype),
                        preferred_element_type=jnp.float32)            # [C, HW]
        m = m_ref[0, t]                                                # [1, HW]
        return s + delta * m

    o_ref[0] = jax.lax.fori_loop(0, num_steps, step, s0)


# ------------------------------ wrapper --------------------------------------
def _fold_perception_weights(w1_weight, chn):
    """Fold the 3x3 stencils of the 4 merged perception filters into fc1.

    wc[f, (i*3 + j)*C + c] = sum_k filters[k, i, j] * w1_weight[f, c*4 + k]
    with k in {identity, sobel_x, sobel_y, lap_x + lap_y}.
    """
    f = w1_weight.shape[0]
    filters = jnp.stack([
        jnp.array([[0., 0., 0.], [0., 1., 0.], [0., 0., 0.]], jnp.float32),
        jnp.array([[-1., 0., 1.], [-2., 0., 2.], [-1., 0., 1.]], jnp.float32),
        jnp.array([[-1., -2., -1.], [0., 0., 0.], [1., 2., 1.]], jnp.float32),
        jnp.array([[1., 2., 1.], [2., -12., 2.], [1., 2., 1.]], jnp.float32),
    ])                                                          # [4, 3, 3]
    w1_ck = w1_weight.astype(jnp.float32).reshape(f, chn, 4)    # ic = c*4 + k
    return jnp.einsum("fck,kij->fijc", w1_ck, filters).reshape(f, 9 * chn)


@functools.partial(jax.jit, static_argnames=("matmul_dtype",))
def nca_rollout(s, w1_weight, w1_bias, w2_weight, masks_dt,
                matmul_dtype=jnp.bfloat16):
    """T fused Euler NCA steps (dx = dy = 1.0, circular padding).

    s        : [B, C, H, W]     f32 cell state (NCHW, as in the torch module)
    w1_weight: [F, 4*C]         fc1 (1x1 conv) weight, input index = c*4 + k
    w1_bias  : [F]
    w2_weight: [C, F]           fc2 (1x1 conv) weight, no bias
    masks_dt : [B, T, 1, H, W]  per-step stochastic update mask * dt
    returns  : [B, C, H, W]     state after T Euler steps
    """
    b, c, h, w = s.shape
    f = w1_weight.shape[0]
    t_steps = masks_dt.shape[1]
    hw = h * w

    wc = _fold_perception_weights(w1_weight, c).astype(matmul_dtype)
    b1 = w1_bias.astype(jnp.float32).reshape(f, 1)
    w2 = w2_weight.astype(matmul_dtype)

    s_flat = s.astype(jnp.float32).reshape(b, c, hw)                 # free reshape
    m_flat = masks_dt.astype(jnp.float32).reshape(b, t_steps, 1, hw)

    out = pl.pallas_call(
        functools.partial(_nca_rollout_kernel, width=w, num_steps=t_steps),
        out_shape=jax.ShapeDtypeStruct((b, c, hw), jnp.float32),
        grid=(b,),
        in_specs=[
            pl.BlockSpec((1, c, hw), lambda i: (i, 0, 0)),             # state
            pl.BlockSpec((1, t_steps, 1, hw), lambda i: (i, 0, 0, 0)),  # masks*dt
            pl.BlockSpec((f, 9 * c), lambda i: (0, 0)),                # folded w1
            pl.BlockSpec((f, 1), lambda i: (0, 0)),                    # b1
            pl.BlockSpec((c, f), lambda i: (0, 0)),                    # w2
        ],
        out_specs=pl.BlockSpec((1, c, hw), lambda i: (i, 0, 0)),
        input_output_aliases={0: 0},
        compiler_params=pltpu.CompilerParams(
            dimension_semantics=("parallel",)),
    )(s_flat, m_flat, wc, b1, w2)

    return out.reshape(b, c, h, w)


def nca_forward(s, w1_weight, w1_bias, w2_weight, mask_dt,
                matmul_dtype=jnp.bfloat16):
    """One Euler NCA step -- matches NCA.forward(s, integrator='euler')."""
    return nca_rollout(s, w1_weight, w1_bias, w2_weight, mask_dt[:, None],
                       matmul_dtype=matmul_dtype)


# ---------------------- pure-JAX reference (for checking) --------------------
def nca_reference_step(s, w1_weight, w1_bias, w2_weight, mask_dt):
    """Torch-faithful step: 5-filter depthwise circular conv + merge_lap."""
    bsz, c, h, w = s.shape
    ident = jnp.array([[0., 0., 0.], [0., 1., 0.], [0., 0., 0.]], jnp.float32)
    sob_x = jnp.array([[-1., 0., 1.], [-2., 0., 2.], [-1., 0., 1.]], jnp.float32)
    lap_x = jnp.array([[0.5, 0., 0.5], [2., -6., 2.], [0.5, 0., 0.5]], jnp.float32)
    bank = [ident, sob_x, sob_x.T, lap_x, lap_x.T]

    def circ_conv(x, filt):  # cross-correlation with circular padding
        acc = jnp.zeros_like(x)
        for i in range(3):
            for j in range(3):
                acc = acc + filt[i, j] * jnp.roll(
                    x, (-(i - 1), -(j - 1)), axis=(2, 3))
        return acc

    z = [circ_conv(s, filt) for filt in bank]
    # merge_lap: channel order c*4 + k with k in {ident, sob_x, sob_y, lap}
    zm = jnp.stack([z[0], z[1], z[2], z[3] + z[4]], axis=2).reshape(bsz, 4 * c, h, w)
    hid = jnp.einsum("fi,bihw->bfhw", w1_weight, zm,
                     precision=jax.lax.Precision.HIGHEST)
    hid = jax.nn.relu(hid + w1_bias[None, :, None, None])
    delta = jnp.einsum("cf,bfhw->bchw", w2_weight, hid,
                       precision=jax.lax.Precision.HIGHEST)
    return s + delta * mask_dt


def nca_reference_rollout(s, w1_weight, w1_bias, w2_weight, masks_dt):
    out = s
    for t in range(masks_dt.shape[1]):
        out = nca_reference_step(out, w1_weight, w1_bias, w2_weight,
                                 masks_dt[:, t])
    return out


# --------------------------------- main ---------------------------------------
if __name__ == "__main__":
    B, CHN, H, W = 2, 8, 16, 16
    FC_DIM = 32
    NUM_STEPS = 8
    UPDATE_PROB = 0.5
    DT = 1.0

    key = jax.random.PRNGKey(0)
    k_s, k_w1, k_b1, k_w2, k_m = jax.random.split(key, 5)

    # cell state
    s = jax.random.normal(k_s, (B, CHN, H, W), dtype=jnp.float32)

    # w1: Conv2d(chn*4, fc_dim, 1) weight, xavier_normal(gain=0.2)-like init.
    fan_in, fan_out = CHN * 4, FC_DIM
    std = 0.2 * (2.0 / (fan_in + fan_out)) ** 0.5
    w1_weight = std * jax.random.normal(k_w1, (FC_DIM, CHN * 4), dtype=jnp.float32)
    w1_bias = 0.01 * jax.random.normal(k_b1, (FC_DIM,), dtype=jnp.float32)
    # w2: the module zero-initializes (trivially identity step); use small
    # random values here so the check is meaningful.
    w2_weight = 0.1 * jax.random.normal(k_w2, (CHN, FC_DIM), dtype=jnp.float32)

    # Per-step stochastic update masks M = floor(rand + update_prob), folded
    # with dt (one fresh mask per Euler step, as in the torch module).
    masks_dt = DT * jnp.floor(
        jax.random.uniform(k_m, (B, NUM_STEPS, 1, H, W), dtype=jnp.float32)
        + UPDATE_PROB)

    # 1) Single step, f32 matmuls: exact parity with NCA.forward (euler).
    out1 = jax.block_until_ready(
        nca_forward(s, w1_weight, w1_bias, w2_weight, masks_dt[:, 0],
                    matmul_dtype=jnp.float32))
    ref1 = nca_reference_step(s, w1_weight, w1_bias, w2_weight, masks_dt[:, 0])
    assert out1.shape == (B, CHN, H, W)
    err1 = float(jnp.max(jnp.abs(out1 - ref1)))
    assert jnp.allclose(out1, ref1, rtol=1e-4, atol=1e-4), err1

    # 2) Fused multi-step rollout, f32 matmuls, vs iterated reference.
    out2 = jax.block_until_ready(
        nca_rollout(s, w1_weight, w1_bias, w2_weight, masks_dt,
                    matmul_dtype=jnp.float32))
    ref2 = nca_reference_rollout(s, w1_weight, w1_bias, w2_weight, masks_dt)
    err2 = float(jnp.max(jnp.abs(out2 - ref2)))
    assert jnp.allclose(out2, ref2, rtol=1e-3, atol=1e-3), err2

    # 3) Fused multi-step rollout on the default fast path (bf16 matmul
    #    operands, f32 accumulation) -- loose-tolerance sanity vs f32 ref.
    out3 = jax.block_until_ready(
        nca_rollout(s, w1_weight, w1_bias, w2_weight, masks_dt))
    err3 = float(jnp.max(jnp.abs(out3 - ref2)))
    assert jnp.allclose(out3, ref2, rtol=1e-1, atol=1e-1), err3

    print("KERNEL_OK")
</pallas_src>

<mosaic_0001>
module attributes {stable_mosaic.version = 11 : i64} {
  func.func @_nca_rollout_kernel(%arg0: i32, %arg1: memref<1x8x256xf32, #tpu.memory_space<vmem>>, %arg2: memref<1x1x1x256xf32, #tpu.memory_space<vmem>>, %arg3: memref<32x72xf32, #tpu.memory_space<vmem>>, %arg4: memref<32x1xf32, #tpu.memory_space<vmem>>, %arg5: memref<8x32xf32, #tpu.memory_space<vmem>>, %arg6: memref<1x8x256xf32, #tpu.memory_space<vmem>>) attributes {dimension_semantics = [#tpu.dimension_semantics<parallel>], iteration_bounds = array<i64: 2>, scalar_prefetch = 0 : i64, scratch_operands = 0 : i64, tpu.core_type = #tpu.core_type<tc>, window_params = [{transform_indices = @transform_0, window_bounds = array<i64: 1, 8, 256>}, {transform_indices = @transform_1, window_bounds = array<i64: 1, 1, 1, 256>}, {pipeline_mode = #tpu.pipeline_mode<synchronous>, transform_indices = @transform_2, window_bounds = array<i64: 32, 72>}, {pipeline_mode = #tpu.pipeline_mode<synchronous>, transform_indices = @transform_3, window_bounds = array<i64: 32, 1>}, {pipeline_mode = #tpu.pipeline_mode<synchronous>, transform_indices = @transform_4, window_bounds = array<i64: 8, 32>}, {transform_indices = @transform_5, window_bounds = array<i64: 1, 8, 256>}]} {
    %c0 = arith.constant 0 : index
    %c0_0 = arith.constant 0 : index
    %c0_1 = arith.constant 0 : index
    %0 = vector.load %arg1[%c0, %c0_0, %c0_1] : memref<1x8x256xf32, #tpu.memory_space<vmem>>, vector<1x8x256xf32>
    %1 = vector.shape_cast %0 : vector<1x8x256xf32> to vector<8x256xf32>
    %c0_2 = arith.constant 0 : index
    %c0_3 = arith.constant 0 : index
    %2 = vector.load %arg3[%c0_2, %c0_3] : memref<32x72xf32, #tpu.memory_space<vmem>>, vector<32x72xf32>
    %c0_4 = arith.constant 0 : index
    %c0_5 = arith.constant 0 : index
    %3 = vector.load %arg4[%c0_4, %c0_5] : memref<32x1xf32, #tpu.memory_space<vmem>>, vector<32x1xf32>
    %c0_6 = arith.constant 0 : index
    %c0_7 = arith.constant 0 : index
    %4 = vector.load %arg5[%c0_6, %c0_7] : memref<8x32xf32, #tpu.memory_space<vmem>>, vector<8x32xf32>
    %5 = tpu.iota {dimensions = array<i32: 1>} : vector<8x256xi32>
    %c16_i32 = arith.constant 16 : i32
    %c0_i32 = arith.constant 0 : i32
    %6 = arith.cmpi eq, %c16_i32, %c0_i32 : i32
    %c1_i32 = arith.constant 1 : i32
    %7 = arith.select %6, %c1_i32, %c16_i32 : i32
    %8 = vector.broadcast %7 : i32 to vector<8x256xi32>
    %9 = arith.remsi %5, %8 : vector<8x256xi32>
    %c0_i32_8 = arith.constant 0 : i32
    %10 = vector.broadcast %c0_i32_8 : i32 to vector<8x256xi32>
    %11 = arith.cmpi ne, %9, %10 : vector<8x256xi32>
    %c0_i32_9 = arith.constant 0 : i32
    %12 = vector.broadcast %c0_i32_9 : i32 to vector<8x256xi32>
    %13 = arith.cmpi slt, %9, %12 : vector<8x256xi32>
    %c0_i32_10 = arith.constant 0 : i32
    %14 = arith.cmpi slt, %7, %c0_i32_10 : i32
    %15 = vector.broadcast %14 : i1 to vector<8x256xi1>
    %16 = vector.broadcast %15 : vector<8x256xi1> to vector<8x256xi1>
    %17 = arith.xori %13, %16 : vector<8x256xi1>
    %18 = arith.andi %17, %11 : vector<8x256xi1>
    %19 = vector.broadcast %7 : i32 to vector<8x256xi32>
    %20 = arith.addi %9, %19 : vector<8x256xi32>
    %21 = arith.select %18, %20, %9 : vector<8x256xi1>, vector<8x256xi32>
    %c0_i32_11 = arith.constant 0 : i32
    %22 = vector.broadcast %c0_i32_11 : i32 to vector<8x256xi32>
    %23 = arith.cmpi eq, %21, %22 : vector<8x256xi32>
    %c15_i32 = arith.constant 15 : i32
    %24 = vector.broadcast %c15_i32 : i32 to vector<8x256xi32>
    %25 = arith.cmpi eq, %21, %24 : vector<8x256xi32>
    %c0_i32_12 = arith.constant 0 : i32
    %c241_i32 = arith.constant 241 : i32
    %26 = tpu.dynamic_rotate %1 by %c241_i32 dim 1 : vector<8x256xf32>, i32 -> vector<8x256xf32>
    %c1_i32_13 = arith.constant 1 : i32
    %27 = tpu.dynamic_rotate %1 by %c1_i32_13 dim 1 : vector<8x256xf32>, i32 -> vector<8x256xf32>
    %28 = arith.select %23, %26, %27 : vector<8x256xi1>, vector<8x256xf32>
    %c15_i32_14 = arith.constant 15 : i32
    %29 = tpu.dynamic_rotate %1 by %c15_i32_14 dim 1 : vector<8x256xf32>, i32 -> vector<8x256xf32>
    %c255_i32 = arith.constant 255 : i32
    %30 = tpu.dynamic_rotate %1 by %c255_i32 dim 1 : vector<8x256xf32>, i32 -> vector<8x256xf32>
    %31 = arith.select %25, %29, %30 : vector<8x256xi1>, vector<8x256xf32>
    %c16_i32_15 = arith.constant 16 : i32
    %32 = tpu.dynamic_rotate %28 by %c16_i32_15 dim 1 : vector<8x256xf32>, i32 -> vector<8x256xf32>
    %c16_i32_16 = arith.constant 16 : i32
    %33 = tpu.dynamic_rotate %1 by %c16_i32_16 dim 1 : vector<8x256xf32>, i32 -> vector<8x256xf32>
    %c16_i32_17 = arith.constant 16 : i32
    %34 = tpu.dynamic_rotate %31 by %c16_i32_17 dim 1 : vector<8x256xf32>, i32 -> vector<8x256xf32>
    %35 = tpu.concatenate %32, %33, %34 in 0 : vector<8x256xf32>, vector<8x256xf32>, vector<8x256xf32> -> vector<24x256xf32>
    %36 = vector.extract_strided_slice %2 {offsets = [0, 0], sizes = [32, 24], strides = [1, 1]} : vector<32x72xf32> to vector<32x24xf32>
    %cst = arith.constant dense<0.000000e+00> : vector<32x256xf32>
    %37 = tpu.matmul %36, %35, %cst {dimension_numbers = #tpu.dot_dimension_numbers<[1], [0], [0], [1], [0, 0, 1, 1], [], []>} : vector<32x24xf32>, vector<24x256xf32>, vector<32x256xf32> -> vector<32x256xf32>
    %38 = tpu.concatenate %28, %1, %31 in 0 : vector<8x256xf32>, vector<8x256xf32>, vector<8x256xf32> -> vector<24x256xf32>
    %39 = vector.extract_strided_slice %2 {offsets = [0, 24], sizes = [32, 24], strides = [1, 1]} : vector<32x72xf32> to vector<32x24xf32>
    %cst_18 = arith.constant dense<0.000000e+00> : vector<32x256xf32>
    %40 = tpu.matmul %39, %38, %cst_18 {dimension_numbers = #tpu.dot_dimension_numbers<[1], [0], [0], [1], [0, 0, 1, 1], [], []>} : vector<32x24xf32>, vector<24x256xf32>, vector<32x256xf32> -> vector<32x256xf32>
    %41 = arith.addf %37, %40 : vector<32x256xf32>
    %c240_i32 = arith.constant 240 : i32
    %42 = tpu.dynamic_rotate %28 by %c240_i32 dim 1 : vector<8x256xf32>, i32 -> vector<8x256xf32>
    %c240_i32_19 = arith.constant 240 : i32
    %43 = tpu.dynamic_rotate %1 by %c240_i32_19 dim 1 : vector<8x256xf32>, i32 -> vector<8x256xf32>
    %c240_i32_20 = arith.constant 240 : i32
    %44 = tpu.dynamic_rotate %31 by %c240_i32_20 dim 1 : vector<8x256xf32>, i32 -> vector<8x256xf32>
    %45 = tpu.concatenate %42, %43, %44 in 0 : vector<8x256xf32>, vector<8x256xf32>, vector<8x256xf32> -> vector<24x256xf32>
    %46 = vector.extract_strided_slice %2 {offsets = [0, 48], sizes = [32, 24], strides = [1, 1]} : vector<32x72xf32> to vector<32x24xf32>
    %cst_21 = arith.constant dense<0.000000e+00> : vector<32x256xf32>
    %47 = tpu.matmul %46, %45, %cst_21 {dimension_numbers = #tpu.dot_dimension_numbers<[1], [0], [0], [1], [0, 0, 1, 1], [], []>} : vector<32x24xf32>, vector<24x256xf32>, vector<32x256xf32> -> vector<32x256xf32>
    %48 = arith.addf %41, %47 : vector<32x256xf32>
    %49 = vector.broadcast %3 : vector<32x1xf32> to vector<32x256xf32>
    %50 = arith.addf %48, %49 : vector<32x256xf32>
    %cst_22 = arith.constant 0.000000e+00 : f32
    %51 = vector.broadcast %cst_22 : f32 to vector<32x256xf32>
    %52 = arith.maximumf %50, %51 : vector<32x256xf32>
    %cst_23 = arith.constant dense<0.000000e+00> : vector<8x256xf32>
    %53 = tpu.matmul %4, %52, %cst_23 {dimension_numbers = #tpu.dot_dimension_numbers<[1], [0], [0], [1], [0, 0, 1, 1], [], []>} : vector<8x32xf32>, vector<32x256xf32>, vector<8x256xf32> -> vector<8x256xf32>
    %c0_24 = arith.constant 0 : index
    %54 = arith.index_cast %c0_i32_12 : i32 to index
    %c0_25 = arith.constant 0 : index
    %c0_26 = arith.constant 0 : index
    %55 = vector.load %arg2[%c0_24, %54, %c0_25, %c0_26] : memref<1x1x1x256xf32, #tpu.memory_space<vmem>>, vector<1x1x1x256xf32>
    %56 = vector.shape_cast %55 : vector<1x1x1x256xf32> to vector<1x256xf32>
    %57 = vector.broadcast %56 : vector<1x256xf32> to vector<8x256xf32>
    %58 = arith.mulf %53, %57 : vector<8x256xf32>
    %59 = arith.addf %1, %58 : vector<8x256xf32>
    %c1_i32_27 = arith.constant 1 : i32
    %c0_28 = arith.constant 0 : index
    %c0_29 = arith.constant 0 : index
    %c0_30 = arith.constant 0 : index
    %60 = vector.load %arg6[%c0_28, %c0_29, %c0_30] : memref<1x8x256xf32, #tpu.memory_space<vmem>>, vector<1x8x256xf32>
    %61 = vector.shape_cast %60 : vector<1x8x256xf32> to vector<8x256xf32>
    %62 = vector.shape_cast %59 : vector<8x256xf32> to vector<1x8x256xf32>
    tpu.vector_store %arg6[%c0_28, %c0_29, %c0_30], %62 {strides = array<i32>} : memref<1x8x256xf32, #tpu.memory_space<vmem>>, vector<1x8x256xf32>,
    return
  }
  func.func @transform_0(%arg0: i32) -> (i32, i32, i32) {
    %c0_i32 = arith.constant 0 : i32
    %c0_i32_0 = arith.constant 0 : i32
    %c0_i32_1 = arith.constant 0 : i32
    return %arg0, %c0_i32, %c0_i32_0 : i32, i32, i32
  }
  func.func @transform_1(%arg0: i32) -> (i32, i32, i32, i32) {
    %c0_i32 = arith.constant 0 : i32
    %c0_i32_0 = arith.constant 0 : i32
    %c0_i32_1 = arith.constant 0 : i32
    %c0_i32_2 = arith.constant 0 : i32
    return %arg0, %c0_i32, %c0_i32_0, %c0_i32_1 : i32, i32, i32, i32
  }
  func.func @transform_2(%arg0: i32) -> (i32, i32) {
    %c0_i32 = arith.constant 0 : i32
    %c0_i32_0 = arith.constant 0 : i32
    %c0_i32_1 = arith.constant 0 : i32
    return %c0_i32, %c0_i32_0 : i32, i32
  }
  func.func @transform_3(%arg0: i32) -> (i32, i32) {
    %c0_i32 = arith.constant 0 : i32
    %c0_i32_0 = arith.constant 0 : i32
    %c0_i32_1 = arith.constant 0 : i32
    return %c0_i32, %c0_i32_0 : i32, i32
  }
  func.func @transform_4(%arg0: i32) -> (i32, i32) {
    %c0_i32 = arith.constant 0 : i32
    %c0_i32_0 = arith.constant 0 : i32
    %c0_i32_1 = arith.constant 0 : i32
    return %c0_i32, %c0_i32_0 : i32, i32
  }
  func.func @transform_5(%arg0: i32) -> (i32, i32, i32) {
    %c0_i32 = arith.constant 0 : i32
    %c0_i32_0 = arith.constant 0 : i32
    %c0_i32_1 = arith.constant 0 : i32
    return %arg0, %c0_i32, %c0_i32_0 : i32, i32, i32
  }
}

</mosaic_0001>

<bundles_post_ra>
// kernel: nca_rollout.1
= control target key start
LH: loop header
LB: loop body
LE: loop exit
PB: predicated region body
PF: predicated region fallthrough
CT: control target
= control target key end

     0   :  { %s1035_s18 = smov 0   ;;  %s1196_s0 = inlined_call_operand.vmem [shape: f32[2,8,256], index: 0, kind: input, shape index: {}, may-alias: {0,5}]   ;;  %s1197_s1 = inlined_call_operand.vmem [shape: f32[2,1,1,256], index: 1, kind: input, shape index: {}]   ;;  %s1198_s2 = inlined_call_operand.vmem [shape: f32[32,72], index: 2, kind: input, shape index: {}]   ;;  %s1199_s3 = inlined_call_operand.vmem [shape: f32[32,1], index: 3, kind: input, shape index: {}]   ;;  %s1200_s4 = inlined_call_operand.vmem [shape: f32[8,32], index: 4, kind: input, shape index: {}]   ;;  %s1201_s5 = inlined_call_operand.vmem [shape: f32[2,8,256], index: 5, kind: output, shape index: {}, may-alias: {0,5}]  }
   0x1 LB: > { %s870_s19 = sadd.s32 4294967295, %s993_s18   ;;  %p874_p0 = scmp.ge.s32.totalorder %s993_s18, 1  ;;  %s993_s18 = sphi %s1035_s18, %s15_s18  }
   0x2   : > { %p196_p1 = scmp.lt.s32.totalorder %s993_s18, 3 }
   0x4   : > { %p197_p2 = pnand %p874_p0, %p196_p1 }
   0x5   : > { %p228_p3 = scmp.lt.s32.totalorder (!%p197_p2), %s870_s19, 1  ;;  %s995_s24 = smov (!%p197_p2), 15   ;;  %v253_v3 = vlaneseq (!%p197_p2)  ;;  %v1001_v28 = vmov (!%p197_p2), 0.0   ;;  %v1087_v32 = vld [vmem:[%s1198_s2 + $0x8] sm:$0xff] (!%p197_p2)  ;;  %v244_v35 = vld [vmem:[%s1198_s2] sm:$0xff] (!%p197_p2)  ;;  %v1103_v36 = vld [vmem:[%s1198_s2 + $0x10] sm:$0xff] (!%p197_p2) }
   0x6   : > { %200 = sbr.rel (%p197_p2) target bundleno = 735 (0x2df), region = 40  ;;  %s996_s25 = smov (!%p197_p2), 113   ;;  %517 = vmatprep.mubr.f32.mxu0 (!%p197_p2), %v1001_v28  ;;  %420 = vmatprep.mubr.f32.mxu1 (!%p197_p2), %v1001_v28  ;;  %v1108_v37 = vld [vmem:[%s1198_s2 + $0x18] sm:$0xff] (!%p197_p2)  ;;  %v1004_v38 = vmov (!%p197_p2), 0   ;;  %v249_v39 = vld [vmem:[%s1199_s3 + $0x8] sm:$0xff] (!%p197_p2)  ;;  %v250_v40 = vld [vmem:[%s1199_s3 + $0x10] sm:$0xff] (!%p197_p2) }
   0x7   : > { %s997_s26 = smov (!%p197_p2), 1   ;;  %s998_s27 = smov (!%p197_p2), 127   ;;  %v1064_v4 = vand.u32 (!%p197_p2), 127, %v253_v3  ;;  %986 = vset.pattern.permute.xlu1 (!%p197_p2), %v1004_v38  ;;  %985 = vset.pattern.permute.xlu0 (!%p197_p2), %v1004_v38  ;;  %v248_v41 = vld [vmem:[%s1199_s3] sm:$0xff] (!%p197_p2)  ;;  %v251_v42 = vld [vmem:[%s1199_s3 + $0x18] sm:$0xff] (!%p197_p2)  ;;  %vm347_vm10 = vcmask (!%p197_p2), 195584  }
   0x8   : > { %s999_s28 = smov (!%p197_p2), 16   ;;  %s1000_s29 = smov (!%p197_p2), 112   ;;  %vm710_vm11 = vcmask (!%p197_p2), 261120  }
   0x9   : > { %v255_v5 = vadd.s32 (!%p197_p2), 128, %v1064_v4  ;;  %v260_v9 = vand.u32 (!%p197_p2), 15, %v1064_v4  ;;  %vm288_vm0 = vcmp.lt.s32.totalorder (!%p197_p2), %v1064_v4, 113  ;;  %vm295_vm1 = vcmp.lt.s32.totalorder (!%p197_p2), %v1064_v4, 1  ;;  %s1002_s7 = smov (!%p197_p2), 104   ;;  %s1003_s10 = smov (!%p197_p2), 80  }
   0xa   : > { %vm304_vm4 = vcmp.lt.s32.totalorder (!%p197_p2), %v1064_v4, 15  ;;  %vm311_vm5 = vcmp.lt.s32.totalorder (!%p197_p2), %v1064_v4, 127  ;;  %vm320_vm8 = vcmp.lt.s32.totalorder (!%p197_p2), %v1064_v4, 16  ;;  %vm546_vm9 = vcmp.lt.s32.totalorder (!%p197_p2), %v1064_v4, 112 }
   0xb   : > { %v267_v8 = vand.u32 (!%p197_p2), 15, %v255_v5  ;;  %vm280_vm3 = vcmp.eq.s32.totalorder (!%p197_p2), %v260_v9, 0  ;;  %vm282_vm7 = vcmp.eq.s32.totalorder (!%p197_p2), %v260_v9, 15 }
   0xd   : > { %s1203_s19 = smov (!%p228_p3, %s870_s19), 1  ;;  %vm281_vm2 = vcmp.eq.s32.totalorder %v267_v8, 0  ;;  %vm283_vm6 = vcmp.eq.s32.totalorder %v267_v8, 15 }
   0xe   : > { %s895_s20 = sshll.u32 %s1203_s19, 4 }
   0xf   : > { %s232_s23 = scalar_lea.vmem %s1196_s0, %s895_s20  ;;  %s241_s9 = scalar_lea.vmem %s1201_s5, %s895_s20 }
  0x10   : > { %v1051_v0 = vld [vmem:[%s232_s23] sm:$0xff]  ;;  %v1053_v1 = vld [vmem:[%s232_s23 + $0x8] sm:$0xff] }
  0x11   : > { %300 = vrot.lane.b32.xlu1 %v1051_v0, %s995_s24  ;;  %v955_v2 = vpack.i.bf16 %v1053_v1, %v1051_v0 }
  0x13   : > { %956 = vrot.lane.b32.xlu0 %v955_v2, %s996_s25 }
  0x15   : > { %302 = vrot.lane.b32.xlu1 %v1053_v1, %s995_s24 }
  0x17   : > { %961 = vrot.lane.b32.xlu0 %v955_v2, %s997_s26 }
  0x19   : > { %309 = vrot.lane.b32.xlu1 %v1053_v1, %s998_s27 }
  0x1b   : > { %307 = vrot.lane.b32.xlu0 %v1051_v0, %s998_s27 }
  0x1d   : > { %966 = vrot.lane.b32.xlu1 %v955_v2, %s999_s28 }
  0x21   : > { %971 = vrot.lane.b32.xlu1 %v955_v2, %s1000_s29 }
  0x83   : > { %v301_v6 = vpop.permute.xlu1 %300 }
  0x85   : > { %v957_v7 = vpop.permute.xlu0 %956 }
  0x86   : > { %v959_v11 = vunpack.i.h.bf16 %v957_v7  ;;  %v958_v12 = vunpack.i.l.bf16 %v957_v7 }
  0x87   : > { %v303_v10 = vpop.permute.xlu1 %302 }
  0x88   : > { %v289_v17 = vsel %vm288_vm0, %v958_v12, %v959_v11  ;;  %v290_v19 = vsel %vm288_vm0, %v959_v11, %v958_v12  ;;  %v305_v24 = vsel %vm304_vm4, %v301_v6, %v303_v10  ;;  %v306_v33 = vsel %vm304_vm4, %v303_v10, %v301_v6 }
  0x89   : > { %v962_v13 = vpop.permute.xlu0 %961 }
  0x8a   : > { %v964_v14 = vunpack.i.h.bf16 %v962_v13  ;;  %v963_v15 = vunpack.i.l.bf16 %v962_v13 }
  0x8b   : > { %v310_v16 = vpop.permute.xlu1 %309 }
  0x8c   : > { %v297_v18 = vsel %vm295_vm1, %v964_v14, %v963_v15  ;;  %v296_v20 = vsel %vm295_vm1, %v963_v15, %v964_v14 }
  0x8d   : > { %v308_v21 = vpop.permute.xlu0 %307  ;;  %v299_v22 = vsel %vm281_vm2, %v290_v19, %v296_v20  ;;  %v298_v23 = vsel %vm280_vm3, %v289_v17, %v297_v18 }
  0x8e   : > { %v313_v25 = vsel %vm311_vm5, %v310_v16, %v308_v21  ;;  %v897_v26 = vpack.c.bf16 %v1053_v1, %v299_v22  ;;  %v975_v27 = vpack.i.bf16 %v299_v22, %v298_v23  ;;  %v899_v30 = vpack.c.bf16 %v1051_v0, %v298_v23 }
  0x8f   : > { %v315_v29 = vsel %vm283_vm6, %v305_v24, %v313_v25  ;;  %v312_v31 = vsel %vm311_vm5, %v308_v21, %v310_v16  ;;  %v967_v43 = vpop.permute.xlu1 %966 }
  0x90   : > { %331 = vrot.lane.b32.xlu1 %v315_v29, %s999_s28  ;;  %898 = vmatprep.subr.bf16.mxu1 %v897_v26  ;;  %v314_v34 = vsel %vm282_vm7, %v306_v33, %v312_v31  ;;  %v969_v45 = vunpack.i.h.bf16 %v967_v43  ;;  %v968_v46 = vunpack.i.l.bf16 %v967_v43 }
  0x91   : > { %976 = vrot.lane.b32.xlu0 %v975_v27, %s999_s28  ;;  %900 = vmatpush1.bf16.msra.mxu1 %v899_v30 }
  0x92   : > { %360 = vmatprep.subr.mxu1 %v315_v29  ;;  %v327_v51 = vsel %vm320_vm8, %v968_v46, %v969_v45  ;;  %v328_v52 = vsel %vm320_vm8, %v969_v45, %v968_v46 }
  0x93   : > { %v972_v44 = vpop.permute.xlu1 %971 }
  0x94   : > { %341 = vrot.lane.b32.xlu1 %v1087_v32, %s1002_s7  ;;  %v974_v59 = vunpack.i.h.bf16 %v972_v44  ;;  %v973_v60 = vunpack.i.l.bf16 %v972_v44 }
  0x95   : > { %329 = vrot.lane.b32.xlu0 %v314_v34, %s999_s28  ;;  %361 = vmatpush1.msra.mxu1 %v314_v34  ;;  %s877_s28 = sshll.u32 %s1203_s19, 1 }
  0x96   : > { %v553_v6 = vsel %vm546_vm9, %v973_v60, %v974_v59  ;;  %v554_v10 = vsel %vm546_vm9, %v974_v59, %v973_v60  ;;  %s236_s6 = scalar_lea.vmem %s1197_s1, %s877_s28 }
  0x98   : > { %557 = vrot.lane.b32.xlu1 %v315_v29, %s1000_s29 }
  0x99   : > { %981 = vrot.lane.b32.xlu0 %v975_v27, %s1000_s29 }
  0x9c   : > { %561 = vrot.lane.b32.xlu1 %v244_v35, %s1003_s10 }
  0x9d   : > { %339 = vrot.lane.b32.xlu0 %v244_v35, %s1002_s7 }
  0xa0   : > { %563 = vrot.lane.b32.xlu1 %v1087_v32, %s1003_s10 }
  0xa1   : > { %555 = vrot.lane.b32.xlu0 %v314_v34, %s1000_s29 }
  0xa4   : > { %567 = vrot.lane.b32.xlu1 %v1108_v37, %s1003_s10 }
  0xa5   : > { %343 = vrot.lane.b32.xlu0 %v1103_v36, %s1002_s7 }
  0xa8   : > { %681 = vperm.xlu1 %986, %v249_v39  }
  0xa9   : > { %345 = vrot.lane.b32.xlu0 %v1108_v37, %s1002_s7 }
  0xac   : > { %686 = vperm.xlu1 %986, %v250_v40  }
  0xad   : > { %565 = vrot.lane.b32.xlu0 %v1103_v36, %s1003_s10 }
  0xb1   : > { %676 = vperm.xlu0 %985, %v248_v41  }
  0xb5   : > { %691 = vperm.xlu0 %985, %v251_v42  }
 0x102   : > { %v332_v47 = vpop.permute.xlu1 %331 }
 0x103   : > { %v977_v48 = vpop.permute.xlu0 %976 }
 0x104   : > { %v979_v49 = vunpack.i.h.bf16 %v977_v48  ;;  %v978_v50 = vunpack.i.l.bf16 %v977_v48 }
 0x106   : > { %v321_v53 = vsel %vm320_vm8, %v978_v50, %v979_v49  ;;  %v322_v54 = vsel %vm320_vm8, %v979_v49, %v978_v50  ;;  %v342_v58 = vpop.permute.xlu1 %341 }
 0x107   : > { %v330_v55 = vpop.permute.xlu0 %329  ;;  %v901_v56 = vpack.c.bf16 %v327_v51, %v321_v53  ;;  %v903_v57 = vpack.c.bf16 %v328_v52, %v322_v54 }
 0x108   : > { %v333_v61 = vsel %vm320_vm8, %v330_v55, %v332_v47  ;;  %v334_v5 = vsel %vm320_vm8, %v332_v47, %v330_v55 }
 0x109   : > { %902 = vmatprep.subr.bf16.mxu0 %v901_v56  ;;  %917 = vmatprep.subr.bf16.mxu1 %v901_v56 }
 0x10a   : > { %904 = vmatpush1.bf16.msra.mxu0 %v903_v57  ;;  %v558_v7 = vpop.permute.xlu1 %557 }
 0x10b   : > { %v982_v62 = vpop.permute.xlu0 %981  ;;  %457 = vmatprep.subr.mxu0 %v333_v61 }
 0x10c   : > { %v984_v63 = vunpack.i.h.bf16 %v982_v62  ;;  %v983_v2 = vunpack.i.l.bf16 %v982_v62 }
 0x10e   : > { %v547_v8 = vsel %vm546_vm9, %v983_v2, %v984_v63  ;;  %458 = vmatpush1.msra.mxu0 %v334_v5  ;;  %v548_v9 = vsel %vm546_vm9, %v984_v63, %v983_v2  ;;  %v562_v14 = vpop.permute.xlu1 %561 }
 0x10f   : > { %v907_v11 = vpack.c.bf16 %v553_v6, %v547_v8  ;;  %v340_v12 = vpop.permute.xlu0 %339  ;;  %884 = vmatmul.mubr.msk.f32.vlgmr.msra.gmra.mrb[0].mxu0 %vm347_vm10, %v244_v35  ;;  %v905_v13 = vpack.c.bf16 %v554_v10, %v548_v9  ;;  %v252_v10 = vld [vmem:[%s1200_s4] sm:$0xff] }
 0x110   : > { %880 = vmatmul.mubr.msk.f32.vlgmr.msra.gmra.mrb[0].mxu1 %vm347_vm10, %v340_v12  ;;  %523 = vmatprep.mubr.f32.mxu0 %v1001_v28 }
 0x111   : > { %919 = vmatpush1.bf16.msra.mxu1 %v903_v57  ;;  %906 = vmatprep.subr.bf16.mxu0 %v905_v13  ;;  %v785_v13 = vld [vmem:[%s236_s6] sm:$0x3] }
 0x112   : > { %918 = vmatprep.subr.mxu1 %v333_v61  ;;  %908 = vmatpush1.bf16.msra.mxu0 %v907_v11  ;;  %v564_v19 = vpop.permute.xlu1 %563  ;;  %v788_v11 = vshrl.u32 %v253_v3, 7 }
 0x113   : > { %v556_v15 = vpop.permute.xlu0 %555  ;;  %426 = vmatprep.mubr.f32.mxu1 %v1001_v28  ;;  %885 = vmatmul.mubr.msk.f32.gmra.mrb[2].mxu0 %vm347_vm10, %v1087_v32 }
 0x114   : > { %v559_v16 = vsel %vm546_vm9, %v556_v15, %v558_v7  ;;  %881 = vmatmul.mubr.msk.f32.gmra.mrb[2].mxu1 %vm347_vm10, %v342_v58  ;;  %v560_v17 = vsel %vm546_vm9, %v558_v7, %v556_v15  ;;  %641 = vmatprep.mubr.f32.mxu0 %v1001_v28  ;;  %v789_v12 = vsub.s32 0, %v788_v11 }
 0x115   : > { %920 = vmatpush1.msra.mxu1 %v334_v5  ;;  %581 = vmatprep.subr.mxu0 %v560_v17 }
 0x116   : > { %582 = vmatpush1.msra.mxu0 %v559_v16  ;;  %432 = vmatprep.mubr.f32.mxu1 %v1001_v28  ;;  %v568_v21 = vpop.permute.xlu1 %567  ;;  %v790_v15 = vrot.slane %v785_v13, %v789_v12 }
 0x117   : > { %v344_v18 = vpop.permute.xlu0 %343  ;;  %888 = vmatmul.mubr.msk.f32.vlgmr.msra.gmra.mrb[0].mxu0 %vm347_vm10, %v562_v14  ;;  %v793_v14 = vsub.s32 1, %v788_v11 }
 0x118   : > { %882 = vmatmul.mubr.msk.f32.gmra.mrb[4].mxu1 %vm347_vm10, %v344_v18  ;;  %647 = vmatprep.mubr.f32.mxu0 %v1001_v28 }
 0x119   : > { %438 = vmatprep.mubr.f32.mxu1 %v1001_v28  ;;  %v794_v16 = vrot.slane %v785_v13, %v793_v14 }
 0x11b   : > { %v346_v20 = vpop.permute.xlu0 %345  ;;  %889 = vmatmul.mubr.msk.f32.gmra.mrb[2].mxu0 %vm347_vm10, %v564_v19 }
 0x11c   : > { %883 = vmatmul.mubr.msk.f32.gmra.mrb[6].mxu1 %vm347_vm10, %v346_v20  ;;  %653 = vmatprep.mubr.f32.mxu0 %v1001_v28 }
 0x11d   : > { %529 = vmatprep.mubr.f32.mxu1 %v1001_v28 }
 0x11f   : > { %v566_v4 = vpop.permute.xlu0 %565 }
 0x120   : > { %886 = vmatmul.mubr.msk.f32.vlgmr.msra.gmra.mrb[4].mxu1 %vm347_vm10, %v1103_v36  ;;  %890 = vmatmul.mubr.msk.f32.gmra.mrb[4].mxu0 %vm347_vm10, %v566_v4 }
 0x121   : > { %535 = vmatprep.mubr.f32.mxu1 %v1001_v28  ;;  %659 = vmatprep.mubr.f32.mxu0 %v1001_v28 }
 0x124   : > { %887 = vmatmul.mubr.msk.f32.gmra.mrb[6].mxu1 %vm347_vm10, %v1108_v37  ;;  %891 = vmatmul.mubr.msk.f32.gmra.mrb[6].mxu0 %vm347_vm10, %v568_v21 }
 0x125   : > { %778 = vmatprep.mubr.f32.mxu1 %v1001_v28 }
 0x127   : > { %v682_v33 = vpop.permute.xlu1 %681 }
 0x12b   : > { %v687_v51 = vpop.permute.xlu1 %686 }
 0x130   : > { %v677_v31 = vpop.permute.xlu0 %676 }
 0x134   : > { %v692_v60 = vpop.permute.xlu0 %691 }
 0x1e3   : > { %v422_v22 = vpop.f32.mrb[0].mxu1 }
 0x1e4   : > { %v424_v23 = vpop.f32.mrb[1].mxu1 }
 0x1e7   : > { %v428_v24 = vpop.f32.mrb[2].mxu1 }
 0x1e8   : > { %v430_v25 = vpop.f32.mrb[3].mxu1 }
 0x1ea   : > { %v643_v26 = vpop.f32.mrb[0].mxu0 }
 0x1eb   : > { %v921_v27 = vadd.f32 %v643_v26, %v422_v22  ;;  %v645_v29 = vpop.f32.mrb[1].mxu0 }
 0x1ec   : > { %v922_v30 = vadd.f32 %v645_v29, %v424_v23 }
 0x1ed   : > { %v694_v34 = vadd.f32 %v921_v27, %v677_v31 }
 0x1ee   : > { %v649_v32 = vpop.f32.mrb[2].mxu0  ;;  %v695_v38 = vadd.f32 %v922_v30, %v677_v31 }
 0x1ef   : > { %v923_v35 = vadd.f32 %v649_v32, %v428_v24  ;;  %v651_v36 = vpop.f32.mrb[3].mxu0  ;;  %v702_v41 = vmax.f32 %v694_v34, 0.0 }
 0x1f0   : > { %v924_v37 = vadd.f32 %v651_v36, %v430_v25  ;;  %v703_v44 = vmax.f32 %v695_v38, 0.0 }
 0x1f1   : > { %v696_v39 = vadd.f32 %v923_v35, %v682_v33 }
 0x1f2   : > { %v697_v40 = vadd.f32 %v924_v37, %v682_v33 }
 0x1f3   : > { %v704_v28 = vmax.f32 %v696_v39, 0.0  ;;  %v531_v42 = vpop.f32.mrb[4].mxu1  ;;  %v655_v43 = vpop.f32.mrb[4].mxu0 }
 0x1f4   : > { %v705_v45 = vmax.f32 %v697_v40, 0.0  ;;  %v925_v46 = vadd.f32 %v655_v43, %v531_v42  ;;  %v533_v47 = vpop.f32.mrb[5].mxu1  ;;  %v657_v48 = vpop.f32.mrb[5].mxu0 }
 0x1f5   : > { %v911_v49 = vpack.c.bf16 %v704_v28, %v702_v41  ;;  %v926_v50 = vadd.f32 %v657_v48, %v533_v47 }
 0x1f6   : > { %v909_v52 = vpack.c.bf16 %v705_v45, %v703_v44  ;;  %v698_v55 = vadd.f32 %v925_v46, %v687_v51 }
 0x1f7   : > { %v537_v53 = vpop.f32.mrb[6].mxu1  ;;  %v661_v54 = vpop.f32.mrb[6].mxu0  ;;  %v699_v59 = vadd.f32 %v926_v50, %v687_v51 }
 0x1f8   : > { %v927_v56 = vadd.f32 %v661_v54, %v537_v53  ;;  %v539_v57 = vpop.f32.mrb[7].mxu1  ;;  %v663_v58 = vpop.f32.mrb[7].mxu0  ;;  %910 = vmatprep.subr.bf16.mxu1 %v909_v52  ;;  %v706_v2 = vmax.f32 %v698_v55, 0.0 }
 0x1f9   : > { %v928_v61 = vadd.f32 %v663_v58, %v539_v57  ;;  %912 = vmatpush1.bf16.msra.mxu1 %v911_v49  ;;  %v707_v6 = vmax.f32 %v699_v59, 0.0 }
 0x1fa   : > { %v700_v62 = vadd.f32 %v927_v56, %v692_v60 }
 0x1fb   : > { %v701_v63 = vadd.f32 %v928_v61, %v692_v60 }
 0x1fc   : > { %v708_v5 = vmax.f32 %v700_v62, 0.0 }
 0x1fd   : > { %v709_v7 = vmax.f32 %v701_v63, 0.0 }
 0x1fe   : > { %v915_v8 = vpack.c.bf16 %v708_v5, %v706_v2 }
 0x1ff   : > { %v913_v9 = vpack.c.bf16 %v709_v7, %v707_v6 }
 0x201   : > { %914 = vmatprep.subr.bf16.mxu1 %v913_v9 }
 0x202   : > { %916 = vmatpush1.bf16.msra.mxu1 %v915_v8 }
 0x205   : > { %892 = vmatmul.mubr.msk.f32.vlgmr.msra.gmra.mrb[8].mxu1 %vm710_vm11, %v252_v10 }
 0x2d8   : > { %v780_v17 = vpop.f32.mrb[8].mxu1 }
 0x2d9   : > { %v797_v18 = vmul.f32 %v790_v15, %v780_v17  ;;  %v782_v19 = vpop.f32.mrb[9].mxu1 }
 0x2da   : > { %v798_v20 = vmul.f32 %v794_v16, %v782_v19 }
 0x2db   : > { %v799_v3 = vadd.f32 %v797_v18, %v1051_v0 }
 0x2dc   : > { %v800_v4 = vadd.f32 %v798_v20, %v1053_v1 }
 0x2dd   : > { %801 = vst [vmem:[%s241_s9] sm:$0xff] %v799_v3 }
 0x2de   : > { %802 = vst [vmem:[%s241_s9 + $0x8] sm:$0xff] %v800_v4 }
 0x2df PF: > { %s15_s18 = sadd.s32 1, %s993_s18  }
 0x2e0   : > { %p12_p4 = scmp.ge.s32.totalorder %s15_s18, 4  }
 0x2e2   :  { %14 = sbr.rel (!%p12_p4) target bundleno = 1 (0x1), region = 73 }

</bundles_post_ra>
